<compile_context>
chip_gen: v7x
topology: tpu7x:2x2x1
jax: 0.10.0
libtpu: 0.0.40
codegen_flags: <defaults>
</compile_context>

<pallas_src>
import jax
import jax.numpy as jnp
from jax import lax
from jax.experimental import pallas as pl
from jax.experimental.pallas import tpu as pltpu


def _round_up(v, m):
    return ((v + m - 1) // m) * m


def _pick_tile_b(B, max_tile=1024):
    """Lane-multiple batch tile; even tile count above max_tile (v7x: 2 TCs)."""
    B_lanes = _round_up(B, 128)
    if B_lanes <= max_tile:
        return B_lanes
    n_tiles = _round_up(pl.cdiv(B_lanes, max_tile), 2)
    return _round_up(pl.cdiv(B_lanes, n_tiles), 128)


def _mlp_kernel_scalar_out(x_ref, w1_ref, w2_ref, sp_ref, oT_ref):
    """One batch tile, output_size == 1 (HNN Hamiltonian head).

    Layouts:
      x_ref  : (TILE_B, D_in)   natural input layout (no wrapper transpose)
      w1_ref : (H, D_in)        torch nn.Linear layout (out, in)
      w2_ref : (H, H)
      sp_ref : (H, 3)           packed small params: [b1 | b2 | w3 column]
      oT_ref : (1, TILE_B)      transposed output tile (lane-dense store)
    """
    sp = sp_ref[...]
    b1 = sp[:, 0:1]
    b2 = sp[:, 1:2]
    w3c = sp[:, 2:3]

    # Contract D_in of w1 with D_in of x -> (H, TILE_B): batch lands on lanes
    # and the MXU absorbs the operand "transpose".
    z1 = lax.dot_general(
        w1_ref[...], x_ref[...],
        dimension_numbers=(((1,), (1,)), ((), ())),
        preferred_element_type=jnp.float32,
    )
    h = jnp.tanh(z1 + b1)
    h = jnp.tanh(jnp.dot(w2_ref[...], h, preferred_element_type=jnp.float32) + b2)
    # Final H -> 1 layer: VPU multiply + sublane reduce (XLU), not an N=1 matmul.
    oT_ref[...] = jnp.sum(w3c * h, axis=0, keepdims=True).astype(oT_ref.dtype)


def _mlp_kernel_general(x_ref, w1_ref, w2_ref, b12_ref, w3_ref, oT_ref):
    """Fallback for output_size > 1 (still batch-on-lanes, MXU final layer)."""
    b12 = b12_ref[...]
    b1 = b12[:, 0:1]
    b2 = b12[:, 1:2]
    z1 = lax.dot_general(
        w1_ref[...], x_ref[...],
        dimension_numbers=(((1,), (1,)), ((), ())),
        preferred_element_type=jnp.float32,
    )
    h = jnp.tanh(z1 + b1)
    h = jnp.tanh(jnp.dot(w2_ref[...], h, preferred_element_type=jnp.float32) + b2)
    oT_ref[...] = jnp.dot(
        w3_ref[...], h, preferred_element_type=jnp.float32
    ).astype(oT_ref.dtype)


def mlp_forward(x, w1, b1, w2, b2, w3, *, tile_b=None):
    """MODEL.forward.

    x  : (B, D_in)
    w1 : (H, D_in), b1 : (H,)      -- torch nn.Linear weight layout (out, in)
    w2 : (H, H),    b2 : (H,)
    w3 : (O, H)                    -- no bias
    returns (B, O)
    """
    B, D_in = x.shape
    H = w1.shape[0]
    O = w3.shape[0]

    if tile_b is None:
        tile_b = _pick_tile_b(B)
    n_tiles = pl.cdiv(B, tile_b)
    B_pad = n_tiles * tile_b
    x_in = jnp.pad(x, ((0, B_pad - B), (0, 0))) if B_pad != B else x

    # Weights: constant index_map -> loaded once, VMEM-resident across the grid.
    const = lambda shape: pl.BlockSpec(shape, lambda i: (0,) * len(shape))
    # Batch-tiled input: stream one (tile_b, D_in) slab per grid step.
    x_spec = pl.BlockSpec((tile_b, D_in), lambda i: (i, 0))
    # Lane-dense transposed output block.
    out_spec = pl.BlockSpec((O, tile_b), lambda i: (0, i))

    if O == 1:
        small = jnp.stack([b1, b2, w3[0]], axis=1).astype(jnp.float32)  # (H, 3)
        kernel = _mlp_kernel_scalar_out
        operands = (x_in, w1, w2, small)
        in_specs = [x_spec, const((H, D_in)), const((H, H)), const((H, 3))]
    else:
        b12 = jnp.stack([b1, b2], axis=1).astype(jnp.float32)           # (H, 2)
        kernel = _mlp_kernel_general
        operands = (x_in, w1, w2, b12, w3)
        in_specs = [x_spec, const((H, D_in)), const((H, H)), const((H, 2)),
                    const((O, H))]

    outT = pl.pallas_call(
        kernel,
        out_shape=jax.ShapeDtypeStruct((O, B_pad), x.dtype),
        grid_spec=pl.GridSpec(
            grid=(n_tiles,),
            in_specs=in_specs,
            out_specs=out_spec,
        ),
        compiler_params=pltpu.CompilerParams(
            dimension_semantics=("parallel",),  # shards batch tiles across TCs
        ),
    )(*operands)

    if O == 1:
        return outT[0, :B].reshape(B, 1)   # no output transpose op
    return outT[:, :B].T                   # (B, O)


def orthogonal_init(key, out_features, in_features, dtype=jnp.float32):
    """Deterministic stand-in for torch.nn.init.orthogonal_ on a (out, in) weight."""
    a = jax.random.normal(
        key,
        (max(out_features, in_features), min(out_features, in_features)),
        dtype=jnp.float32,
    )
    q, r = jnp.linalg.qr(a)
    q = q * jnp.sign(jnp.diag(r))[None, :]
    w = q if out_features >= in_features else q.T
    return w.astype(dtype)  # (out_features, in_features)


if __name__ == "__main__":
    # HNN-style sizes: input_dim=4 (q, qdot pairs), hidden=32, scalar output.
    # B=200 exercises the pad path (200 -> 256, one lane-dense tile).
    B, input_dim, hidden_dim, output_size = 200, 4, 32, 1

    key = jax.random.PRNGKey(0)
    k_x, k_w1, k_b1, k_w2, k_b2, k_w3 = jax.random.split(key, 6)

    x = jax.random.normal(k_x, (B, input_dim), dtype=jnp.float32)

    # torch nn.Linear layout: weight (out, in), bias (out,)
    w1 = orthogonal_init(k_w1, hidden_dim, input_dim)          # (H, D_in)
    b1 = (0.01 * jax.random.normal(k_b1, (hidden_dim,))).astype(jnp.float32)
    w2 = orthogonal_init(k_w2, hidden_dim, hidden_dim)         # (H, H)
    b2 = (0.01 * jax.random.normal(k_b2, (hidden_dim,))).astype(jnp.float32)
    w3 = orthogonal_init(k_w3, output_size, hidden_dim)        # (O, H), no bias

    out = mlp_forward(x, w1, b1, w2, b2, w3)
    jax.block_until_ready(out)

    # Pure-JAX reference of the same forward pass (torch convention: x @ W^T + b).
    ref = jnp.tanh(x @ w1.T + b1[None, :])
    ref = jnp.tanh(ref @ w2.T + b2[None, :])
    ref = ref @ w3.T

    assert out.shape == (B, output_size)
    assert jnp.allclose(out, ref, atol=1e-5, rtol=1e-5)

    # Also exercise the O > 1 fallback kernel once.
    O2 = 3
    w3b = orthogonal_init(jax.random.fold_in(k_w3, 1), O2, hidden_dim)
    out2 = mlp_forward(x, w1, b1, w2, b2, w3b)
    jax.block_until_ready(out2)
    ref2 = jnp.tanh(x @ w1.T + b1[None, :])
    ref2 = jnp.tanh(ref2 @ w2.T + b2[None, :]) @ w3b.T
    assert out2.shape == (B, O2)
    assert jnp.allclose(out2, ref2, atol=1e-5, rtol=1e-5)

    # TODO(synk): rk4/M_matrix/block_diag/Hpartials use torch.autograd and
    # torch.inverse and are outside MODEL.forward; fusing the 4 RK4 stages /
    # forward+VJP into one pallas_call (weights loaded once) is the next win
    # but only the forward pass is implemented here.
    print("KERNEL_OK")
</pallas_src>

<mosaic_0001>
module attributes {stable_mosaic.version = 11 : i64} {
  func.func @_mlp_kernel_scalar_out(%arg0: i32, %arg1: memref<256x4xf32, #tpu.memory_space<vmem>>, %arg2: memref<32x4xf32, #tpu.memory_space<vmem>>, %arg3: memref<32x32xf32, #tpu.memory_space<vmem>>, %arg4: memref<32x3xf32, #tpu.memory_space<vmem>>, %arg5: memref<1x256xf32, #tpu.memory_space<vmem>>) attributes {dimension_semantics = [#tpu.dimension_semantics<parallel>], iteration_bounds = array<i64: 1>, scalar_prefetch = 0 : i64, scratch_operands = 0 : i64, tpu.core_type = #tpu.core_type<tc>, window_params = [{transform_indices = @transform_0, window_bounds = array<i64: 256, 4>}, {pipeline_mode = #tpu.pipeline_mode<synchronous>, transform_indices = @transform_1, window_bounds = array<i64: 32, 4>}, {pipeline_mode = #tpu.pipeline_mode<synchronous>, transform_indices = @transform_2, window_bounds = array<i64: 32, 32>}, {pipeline_mode = #tpu.pipeline_mode<synchronous>, transform_indices = @transform_3, window_bounds = array<i64: 32, 3>}, {transform_indices = @transform_4, window_bounds = array<i64: 1, 256>}]} {
    %c0 = arith.constant 0 : index
    %c0_0 = arith.constant 0 : index
    %0 = vector.load %arg4[%c0, %c0_0] : memref<32x3xf32, #tpu.memory_space<vmem>>, vector<32x3xf32>
    %1 = vector.extract_strided_slice %0 {offsets = [0, 0], sizes = [32, 1], strides = [1, 1]} : vector<32x3xf32> to vector<32x1xf32>
    %2 = vector.extract_strided_slice %0 {offsets = [0, 1], sizes = [32, 1], strides = [1, 1]} : vector<32x3xf32> to vector<32x1xf32>
    %3 = vector.extract_strided_slice %0 {offsets = [0, 2], sizes = [32, 1], strides = [1, 1]} : vector<32x3xf32> to vector<32x1xf32>
    %c0_1 = arith.constant 0 : index
    %c0_2 = arith.constant 0 : index
    %4 = vector.load %arg2[%c0_1, %c0_2] : memref<32x4xf32, #tpu.memory_space<vmem>>, vector<32x4xf32>
    %c0_3 = arith.constant 0 : index
    %c0_4 = arith.constant 0 : index
    %5 = vector.load %arg1[%c0_3, %c0_4] : memref<256x4xf32, #tpu.memory_space<vmem>>, vector<256x4xf32>
    %cst = arith.constant dense<0.000000e+00> : vector<32x256xf32>
    %6 = tpu.matmul %4, %5, %cst {dimension_numbers = #tpu.dot_dimension_numbers<[1], [1], [0], [0], [0, 0, 1, 0], [], []>} : vector<32x4xf32>, vector<256x4xf32>, vector<32x256xf32> -> vector<32x256xf32>
    %7 = vector.broadcast %1 : vector<32x1xf32> to vector<32x256xf32>
    %8 = arith.addf %6, %7 : vector<32x256xf32>
    %9 = math.tanh %8 : vector<32x256xf32>
    %c0_5 = arith.constant 0 : index
    %c0_6 = arith.constant 0 : index
    %10 = vector.load %arg3[%c0_5, %c0_6] : memref<32x32xf32, #tpu.memory_space<vmem>>, vector<32x32xf32>
    %cst_7 = arith.constant dense<0.000000e+00> : vector<32x256xf32>
    %11 = tpu.matmul %10, %9, %cst_7 {dimension_numbers = #tpu.dot_dimension_numbers<[1], [0], [0], [1], [0, 0, 1, 1], [], []>} : vector<32x32xf32>, vector<32x256xf32>, vector<32x256xf32> -> vector<32x256xf32>
    %12 = vector.broadcast %2 : vector<32x1xf32> to vector<32x256xf32>
    %13 = arith.addf %11, %12 : vector<32x256xf32>
    %14 = math.tanh %13 : vector<32x256xf32>
    %15 = vector.broadcast %3 : vector<32x1xf32> to vector<32x256xf32>
    %16 = arith.mulf %15, %14 : vector<32x256xf32>
    %cst_8 = arith.constant dense<0.000000e+00> : vector<256xf32>
    %17 = vector.multi_reduction <add>, %16, %cst_8 [0] : vector<32x256xf32> to vector<256xf32>
    %18 = vector.shape_cast %17 : vector<256xf32> to vector<1x256xf32>
    %c0_9 = arith.constant 0 : index
    %c0_10 = arith.constant 0 : index
    %19 = vector.load %arg5[%c0_9, %c0_10] : memref<1x256xf32, #tpu.memory_space<vmem>>, vector<1x256xf32>
    tpu.vector_store %arg5[%c0_9, %c0_10], %18 {strides = array<i32>} : memref<1x256xf32, #tpu.memory_space<vmem>>, vector<1x256xf32>,
    return
  }
  func.func @transform_0(%arg0: i32) -> (i32, i32) {
    %c0_i32 = arith.constant 0 : i32
    %c0_i32_0 = arith.constant 0 : i32
    return %arg0, %c0_i32 : i32, i32
  }
  func.func @transform_1(%arg0: i32) -> (i32, i32) {
    %c0_i32 = arith.constant 0 : i32
    %c0_i32_0 = arith.constant 0 : i32
    %c0_i32_1 = arith.constant 0 : i32
    return %c0_i32, %c0_i32_0 : i32, i32
  }
  func.func @transform_2(%arg0: i32) -> (i32, i32) {
    %c0_i32 = arith.constant 0 : i32
    %c0_i32_0 = arith.constant 0 : i32
    %c0_i32_1 = arith.constant 0 : i32
    return %c0_i32, %c0_i32_0 : i32, i32
  }
  func.func @transform_3(%arg0: i32) -> (i32, i32) {
    %c0_i32 = arith.constant 0 : i32
    %c0_i32_0 = arith.constant 0 : i32
    %c0_i32_1 = arith.constant 0 : i32
    return %c0_i32, %c0_i32_0 : i32, i32
  }
  func.func @transform_4(%arg0: i32) -> (i32, i32) {
    %c0_i32 = arith.constant 0 : i32
    %c0_i32_0 = arith.constant 0 : i32
    return %c0_i32, %arg0 : i32, i32
  }
}

</mosaic_0001>

<bundles_post_ra>
// kernel: tpu_custom_call.1
= control target key start
LH: loop header
LB: loop body
LE: loop exit
PB: predicated region body
PF: predicated region fallthrough
CT: control target
= control target key end

     0   :  { %vm78_vm0 = vcmask 31744   ;;  %v697_v7 = vmov 0   ;;  %s942_s0 = inlined_call_operand.vmem [shape: f32[256,4], index: 0, kind: input, shape index: {}]   ;;  %s943_s1 = inlined_call_operand.vmem [shape: f32[32,4], index: 1, kind: input, shape index: {}]   ;;  %s944_s2 = inlined_call_operand.vmem [shape: f32[32,32], index: 2, kind: input, shape index: {}]   ;;  %s945_s3 = inlined_call_operand.vmem [shape: f32[32,3], index: 3, kind: input, shape index: {}]   ;;  %s946_s4 = inlined_call_operand.hbm [shape: f32[1,256], index: 4, kind: output, shape index: {}]  }
   0x1   :  { %v42_v0 = vld [vmem:[%s942_s0 + $0x80] sm:$0xff]  ;;  %v43_v1 = vld [vmem:[%s942_s0 + $0x88] sm:$0xff]  ;;  %vm739_vm1 = vmpackc.low %vm78_vm0, %vm78_vm0  ;;  %635 = vset.pattern.permute.xlu0 %v697_v7  ;;  %636 = vset.pattern.permute.xlu1 %v697_v7 }
   0x2   :  { %v26_v2 = vld [vmem:[%s942_s0] sm:$0xff]  ;;  %v573_v3 = vpack.c.bf16 %v43_v1, %v42_v0  ;;  %v27_v5 = vld [vmem:[%s942_s0 + $0x8] sm:$0xff]  ;;  %v44_v6 = vld [vmem:[%s942_s0 + $0x90] sm:$0xff] }
   0x3   :  { %v576_v8 = vpack.c.bf16 %v27_v5, %v26_v2  ;;  %v45_v9 = vld [vmem:[%s942_s0 + $0x98] sm:$0xff]  ;;  %v28_v11 = vld [vmem:[%s942_s0 + $0x10] sm:$0xff]  ;;  %v46_v13 = vld [vmem:[%s942_s0 + $0xa0] sm:$0xff] }
   0x4   :  { %575 = vmatprep.subr.msk.bf16.mxu0 %vm739_vm1, %v573_v3  ;;  %v579_v10 = vpack.c.bf16 %v45_v9, %v44_v6  ;;  %v29_v12 = vld [vmem:[%s942_s0 + $0x18] sm:$0xff]  ;;  %v47_v14 = vld [vmem:[%s942_s0 + $0xa8] sm:$0xff]  ;;  %v22_v17 = vld [vmem:[%s943_s1] sm:$0xff] }
   0x5   :  { %578 = vmatpush3.bf16.xpose.msk.msra.mxu0 %vm739_vm1, %v576_v8  ;;  %v582_v15 = vpack.c.bf16 %v29_v12, %v28_v11  ;;  %v585_v16 = vpack.c.bf16 %v47_v14, %v46_v13  ;;  %v30_v18 = vld [vmem:[%s942_s0 + $0x20] sm:$0xff]  ;;  %565 = vmatprep.mubr.msk.f32.mxu0 %vm78_vm0, %v22_v17  ;;  %v31_v20 = vld [vmem:[%s942_s0 + $0x28] sm:$0xff]  ;;  %v793_v21 = vld [vmem:[%s945_s3 + $0x10] sm:$0xff] }
   0x6   :  { %581 = vmatprep.subr.msk.bf16.mxu0 %vm739_vm1, %v579_v10  ;;  %v782_v19 = vld [vmem:[%s945_s3] sm:$0xff] }
   0x7   :  { %60 = vperm.xlu0 %635, %v782_v19  }
   0xd   :  { %584 = vmatpush3.bf16.xpose.msk.msra.mxu0 %vm739_vm1, %v582_v15 }
   0xe   :  { %587 = vmatprep.subr.msk.bf16.mxu0 %vm739_vm1, %v585_v16 }
   0xf   :  { %9 = vsyncpa [#allocation3], 0  ;;  %v48_v22 = vld [vmem:[%s942_s0 + $0xb0] sm:$0xff]  ;;  %v49_v23 = vld [vmem:[%s942_s0 + $0xb8] sm:$0xff]  ;;  %70 = vperm.xlu1 %636, %v793_v21   ;;  %v588_v26 = vpack.c.bf16 %v31_v20, %v30_v18  ;;  %v698_v58 = vmov 0.0   ;;  %v699_v59 = vmov 1  }
  0x10   :  { %v804_v24 = vld [vmem:[%s945_s3 + $0x8] sm:$0xff]  ;;  %v810_v25 = vld [vmem:[%s945_s3 + $0x18] sm:$0xff]  ;;  %v591_v27 = vpack.c.bf16 %v49_v23, %v48_v22  ;;  %v32_v28 = vld [vmem:[%s942_s0 + $0x30] sm:$0xff]  ;;  %381 = vmatprep.mubr.f32.mxu1 %v698_v58  ;;  %v700_v60 = vmov 2   ;;  %vm304_vm2 = vcmask 261120  }
  0x11   :  { %65 = vperm.xlu0 %635, %v804_v24   ;;  %v33_v29 = vld [vmem:[%s942_s0 + $0x38] sm:$0xff]  ;;  %v50_v30 = vld [vmem:[%s942_s0 + $0xc0] sm:$0xff]  ;;  %v51_v31 = vld [vmem:[%s942_s0 + $0xc8] sm:$0xff] }
  0x12   :  { %v594_v32 = vpack.c.bf16 %v33_v29, %v32_v28  ;;  %v597_v33 = vpack.c.bf16 %v51_v31, %v50_v30  ;;  %v34_v34 = vld [vmem:[%s942_s0 + $0x40] sm:$0xff]  ;;  %v35_v35 = vld [vmem:[%s942_s0 + $0x48] sm:$0xff]  ;;  %v52_v36 = vld [vmem:[%s942_s0 + $0xd0] sm:$0xff] }
  0x13   :  { %75 = vperm.xlu1 %636, %v810_v25   ;;  %v53_v37 = vld [vmem:[%s942_s0 + $0xd8] sm:$0xff]  ;;  %v600_v38 = vpack.c.bf16 %v35_v35, %v34_v34  ;;  %v36_v40 = vld [vmem:[%s942_s0 + $0x50] sm:$0xff]  ;;  %v54_v42 = vld [vmem:[%s942_s0 + $0xe0] sm:$0xff] }
  0x14   :  { %v603_v39 = vpack.c.bf16 %v53_v37, %v52_v36  ;;  %v37_v41 = vld [vmem:[%s942_s0 + $0x58] sm:$0xff]  ;;  %v55_v43 = vld [vmem:[%s942_s0 + $0xe8] sm:$0xff]  ;;  %v38_v46 = vld [vmem:[%s942_s0 + $0x60] sm:$0xff] }
  0x15   :  { %590 = vmatpush3.bf16.xpose.msk.msra.mxu0 %vm739_vm1, %v588_v26  ;;  %v606_v44 = vpack.c.bf16 %v37_v41, %v36_v40  ;;  %v609_v45 = vpack.c.bf16 %v55_v43, %v54_v42  ;;  %v39_v47 = vld [vmem:[%s942_s0 + $0x68] sm:$0xff]  ;;  %v56_v48 = vld [vmem:[%s942_s0 + $0xf0] sm:$0xff]  ;;  %v57_v49 = vld [vmem:[%s942_s0 + $0xf8] sm:$0xff]  ;;  %637 = vset.pattern.permute.xlu0 %v699_v59 }
  0x16   :  { %593 = vmatprep.subr.msk.bf16.mxu0 %vm739_vm1, %v591_v27  ;;  %v612_v50 = vpack.c.bf16 %v39_v47, %v38_v46  ;;  %v615_v51 = vpack.c.bf16 %v57_v49, %v56_v48  ;;  %v40_v52 = vld [vmem:[%s942_s0 + $0x70] sm:$0xff]  ;;  %v41_v53 = vld [vmem:[%s942_s0 + $0x78] sm:$0xff]  ;;  %v23_v55 = vld [vmem:[%s943_s1 + $0x8] sm:$0xff]  ;;  %289 = vperm.xlu0 %637, %v782_v19  }
  0x17   :  { %v618_v54 = vpack.c.bf16 %v41_v53, %v40_v52  ;;  %v24_v56 = vld [vmem:[%s943_s1 + $0x10] sm:$0xff]  ;;  %v25_v57 = vld [vmem:[%s943_s1 + $0x18] sm:$0xff]  ;;  %638 = vset.pattern.permute.xlu1 %v699_v59  ;;  %v284_v29 = vld [vmem:[%s944_s2] sm:$0xff] }
  0x18   :  { %293 = vperm.xlu1 %638, %v804_v24   ;;  %v285_v30 = vld [vmem:[%s944_s2 + $0x8] sm:$0xff]  ;;  %v286_v31 = vld [vmem:[%s944_s2 + $0x10] sm:$0xff] }
  0x1a   :  { %301 = vperm.xlu0 %637, %v810_v25  }
  0x1c   :  { %297 = vperm.xlu1 %638, %v793_v21  }
  0x1d   :  { %596 = vmatpush3.bf16.xpose.msk.msra.mxu0 %vm739_vm1, %v594_v32  ;;  %v287_v32 = vld [vmem:[%s944_s2 + $0x18] sm:$0xff]  ;;  %s702_s2 = smov [#allocation2]  }
  0x1e   :  { %599 = vmatprep.subr.msk.bf16.mxu0 %vm739_vm1, %v597_v33  ;;  %640 = vset.pattern.permute.xlu0 %v700_v60  ;;  %s485_s21 = sshll.u32 %s702_s2, 4  ;;  %s486_s21 = int_to_ptr.vmem [resolvable:$true] %s485_s21 }
  0x1f   :  { %419 = vperm.xlu0 %640, %v804_v24   ;;  %s673_s22 = scalar_lea.vmem %s486_s21, 32  ;;  %p678_p1 = scmp.lt.s32.totalorder %s486_s21, %s486_s21 }
  0x20   :  { %639 = vset.pattern.permute.xlu1 %v700_v60  ;;  %p674_p0 = scmp.ne.s32.totalorder %s486_s21, %s673_s22  ;;  %p679_p2 = scmp.lt.s32.totalorder %s673_s22, %s673_s22 }
  0x21   :  { %415 = vperm.xlu1 %639, %v782_v19  }
  0x22   :  { %p680_p3 = por %p679_p2, %p678_p1 }
  0x24   :  { %p681_p4 = pnand %p680_p3, %p674_p0 }
  0x25   :  { %602 = vmatpush3.bf16.xpose.msk.msra.mxu0 %vm739_vm1, %v600_v38  ;;  %423 = vperm.xlu1 %639, %v793_v21  }
  0x26   :  { %605 = vmatprep.subr.msk.bf16.mxu0 %vm739_vm1, %v603_v39 }
  0x29   :  { %427 = vperm.xlu1 %639, %v810_v25  }
  0x2d   :  { %608 = vmatpush3.bf16.xpose.msk.msra.mxu0 %vm739_vm1, %v606_v44 }
  0x2e   :  { %611 = vmatprep.subr.msk.bf16.mxu0 %vm739_vm1, %v609_v45 }
  0x35   :  { %614 = vmatpush3.bf16.xpose.msk.msra.mxu0 %vm739_vm1, %v612_v50 }
  0x36   :  { %617 = vmatprep.subr.msk.bf16.mxu0 %vm739_vm1, %v615_v51 }
  0x3d   :  { %620 = vmatpush3.bf16.xpose.msk.msra.mxu0 %vm739_vm1, %v618_v54 }
  0x44   :  { %566 = vmatmul.mubr.msk.f32.vlgmr.msra.gmra.mrb[0].mxu0 %vm78_vm0, %v22_v17 }
  0x45   :  { %567 = vmatprep.mubr.msk.f32.mxu0 %vm78_vm0, %v23_v55 }
  0x48   :  { %568 = vmatmul.mubr.msk.f32.gmra.mrb[2].mxu0 %vm78_vm0, %v23_v55 }
  0x49   :  { %569 = vmatprep.mubr.msk.f32.mxu0 %vm78_vm0, %v24_v56 }
  0x4c   :  { %570 = vmatmul.mubr.msk.f32.gmra.mrb[4].mxu0 %vm78_vm0, %v24_v56 }
  0x4d   :  { %571 = vmatprep.mubr.msk.f32.mxu0 %vm78_vm0, %v25_v57 }
  0x50   :  { %572 = vmatmul.mubr.msk.f32.gmra.mrb[6].mxu0 %vm78_vm0, %v25_v57 }
  0x86   :  { %v61_v61 = vpop.permute.xlu0 %60 }
  0x8e   :  { %v71_v7 = vpop.permute.xlu1 %70 }
  0x90   :  { %v66_v2 = vpop.permute.xlu0 %65 }
  0x92   :  { %v76_v12 = vpop.permute.xlu1 %75 }
  0x95   :  { %v290_v33 = vpop.permute.xlu0 %289 }
  0x97   :  { %v294_v37 = vpop.permute.xlu1 %293 }
  0x99   :  { %v302_v48 = vpop.permute.xlu0 %301 }
  0x9b   :  { %v298_v43 = vpop.permute.xlu1 %297 }
  0x9e   :  { %v420_v55 = vpop.permute.xlu0 %419 }
  0xa0   :  { %v416_v50 = vpop.permute.xlu1 %415 }
 0x117   :  { %v253_v62 = vpop.f32.mrb[0].mxu0 }
 0x118   :  { %v254_v63 = vadd.f32 %v253_v62, %v61_v61  ;;  %v255_v0 = vpop.f32.mrb[1].mxu0  ;;  %v424_v62 = vpop.permute.xlu1 %423 }
 0x119   :  { %v256_v1 = vadd.f32 %v255_v0, %v61_v61 }
 0x11a   :  { %641 = vtanh.f32 %v254_v63 }
 0x11b   :  { %v259_v3 = vpop.f32.mrb[2].mxu0  ;;  %643 = vtanh.f32 %v256_v1 }
 0x11c   :  { %v260_v4 = vadd.f32 %v259_v3, %v66_v2  ;;  %v261_v5 = vpop.f32.mrb[3].mxu0 }
 0x11d   :  { %v262_v6 = vadd.f32 %v261_v5, %v66_v2 }
 0x11e   :  { %645 = vtanh.f32 %v260_v4 }
 0x11f   :  { %647 = vtanh.f32 %v262_v6  ;;  %v265_v8 = vpop.f32.mrb[4].mxu0 }
 0x120   :  { %v266_v9 = vadd.f32 %v265_v8, %v71_v7  ;;  %v267_v10 = vpop.f32.mrb[5].mxu0  ;;  %v428_v8 = vpop.permute.xlu1 %427 }
 0x121   :  { %v268_v11 = vadd.f32 %v267_v10, %v71_v7 }
 0x122   :  { %649 = vtanh.f32 %v266_v9 }
 0x123   :  { %v271_v13 = vpop.f32.mrb[6].mxu0  ;;  %651 = vtanh.f32 %v268_v11 }
 0x124   :  { %v272_v14 = vadd.f32 %v271_v13, %v76_v12  ;;  %v273_v15 = vpop.f32.mrb[7].mxu0  ;;  %v642_v17 = vpop.eup %641 }
 0x125   :  { %v274_v16 = vadd.f32 %v273_v15, %v76_v12  ;;  %v644_v18 = vpop.eup %643 }
 0x126   :  { %653 = vtanh.f32 %v272_v14 }
 0x127   :  { %655 = vtanh.f32 %v274_v16 }
 0x128   :  { %v646_v19 = vpop.eup %645 }
 0x129   :  { %v648_v20 = vpop.eup %647  ;;  %v623_v21 = vpack.c.bf16 %v646_v19, %v642_v17  ;;  %v701_v19 = vmov 1966171168  }
 0x12a   :  { %v621_v22 = vpack.c.bf16 %v648_v20, %v644_v18  ;;  %v460_v20 = vunpack.c.l.s4 %v701_v19 }
 0x12c   :  { %622 = vmatprep.subr.bf16.mxu1 %v621_v22  ;;  %v650_v23 = vpop.eup %649 }
 0x12d   :  { %624 = vmatpush1.bf16.msra.mxu1 %v623_v21  ;;  %v652_v24 = vpop.eup %651  ;;  %v462_v21 = vlaneseq }
 0x12f   :  { %vm476_vm3 = vcmp.lt.s32.totalorder %v462_v21, 256 }
 0x130   :  { %v654_v25 = vpop.eup %653 }
 0x131   :  { %v656_v26 = vpop.eup %655  ;;  %v627_v27 = vpack.c.bf16 %v654_v25, %v650_v23 }
 0x132   :  { %v625_v28 = vpack.c.bf16 %v656_v26, %v652_v24  ;;  %v461_v26 = vunpack.c.0.s8 %v460_v20 }
 0x134   :  { %626 = vmatprep.subr.bf16.mxu1 %v625_v28 }
 0x135   :  { %628 = vmatpush1.bf16.msra.mxu1 %v627_v27  ;;  %v463_v27 = vshrl.u32 %v462_v21, 7 }
 0x138   :  { %529 = vmatmul.mubr.msk.f32.vlgmr.msra.gmra.mrb[0].mxu1 %vm304_vm2, %v284_v29 }
 0x139   :  { %387 = vmatprep.mubr.f32.mxu1 %v698_v58 }
 0x13c   :  { %530 = vmatmul.mubr.msk.f32.gmra.mrb[2].mxu1 %vm304_vm2, %v285_v30 }
 0x13d   :  { %393 = vmatprep.mubr.f32.mxu1 %v698_v58 }
 0x140   :  { %531 = vmatmul.mubr.msk.f32.gmra.mrb[4].mxu1 %vm304_vm2, %v286_v31 }
 0x141   :  { %399 = vmatprep.mubr.f32.mxu1 %v698_v58 }
 0x144   :  { %532 = vmatmul.mubr.msk.f32.gmra.mrb[6].mxu1 %vm304_vm2, %v287_v32  ;;  %v464_v32 = vsub.s32 %v461_v26, %v463_v27 }
 0x20b   :  { %v383_v34 = vpop.f32.mrb[0].mxu1 }
 0x20c   :  { %v384_v35 = vadd.f32 %v383_v34, %v290_v33  ;;  %v385_v36 = vpop.f32.mrb[1].mxu1 }
 0x20d   :  { %v386_v38 = vadd.f32 %v385_v36, %v290_v33 }
 0x20e   :  { %657 = vtanh.f32 %v384_v35 }
 0x20f   :  { %v389_v39 = vpop.f32.mrb[2].mxu1  ;;  %659 = vtanh.f32 %v386_v38 }
 0x210   :  { %v390_v40 = vadd.f32 %v389_v39, %v294_v37  ;;  %v391_v41 = vpop.f32.mrb[3].mxu1 }
 0x211   :  { %v392_v42 = vadd.f32 %v391_v41, %v294_v37 }
 0x212   :  { %661 = vtanh.f32 %v390_v40 }
 0x213   :  { %663 = vtanh.f32 %v392_v42  ;;  %v395_v44 = vpop.f32.mrb[4].mxu1 }
 0x214   :  { %v396_v45 = vadd.f32 %v395_v44, %v298_v43  ;;  %v397_v46 = vpop.f32.mrb[5].mxu1 }
 0x215   :  { %v398_v47 = vadd.f32 %v397_v46, %v298_v43 }
 0x216   :  { %665 = vtanh.f32 %v396_v45 }
 0x217   :  { %667 = vtanh.f32 %v398_v47  ;;  %v401_v49 = vpop.f32.mrb[6].mxu1 }
 0x218   :  { %v402_v51 = vadd.f32 %v401_v49, %v302_v48  ;;  %v403_v52 = vpop.f32.mrb[7].mxu1  ;;  %v658_v54 = vpop.eup %657 }
 0x219   :  { %v404_v53 = vadd.f32 %v403_v52, %v302_v48  ;;  %v660_v56 = vpop.eup %659  ;;  %v430_v59 = vmul.f32 %v658_v54, %v416_v50 }
 0x21a   :  { %669 = vtanh.f32 %v402_v51  ;;  %v431_v61 = vmul.f32 %v660_v56, %v416_v50 }
 0x21b   :  { %671 = vtanh.f32 %v404_v53 }
 0x21c   :  { %v662_v57 = vpop.eup %661 }
 0x21d   :  { %v664_v58 = vpop.eup %663  ;;  %v432_v60 = vmul.f32 %v662_v57, %v420_v55 }
 0x21e   :  { %v433_v63 = vmul.f32 %v664_v58, %v420_v55 }
 0x21f   :  { %v438_v0 = vadd.f32 %v432_v60, %v430_v59 }
 0x220   :  { %v666_v1 = vpop.eup %665  ;;  %v447_v2 = vadd.f32 %v433_v63, %v431_v61 }
 0x221   :  { %v668_v3 = vpop.eup %667  ;;  %v434_v4 = vmul.f32 %v666_v1, %v424_v62 }
 0x222   :  { %v435_v5 = vmul.f32 %v668_v3, %v424_v62 }
 0x223   :  { %v439_v6 = vadd.f32 %v438_v0, %v434_v4 }
 0x224   :  { %v670_v7 = vpop.eup %669  ;;  %v448_v9 = vadd.f32 %v447_v2, %v435_v5 }
 0x225   :  { %v672_v10 = vpop.eup %671  ;;  %v436_v11 = vmul.f32 %v670_v7, %v428_v8 }
 0x226   :  { %v437_v12 = vmul.f32 %v672_v10, %v428_v8 }
 0x227   :  { %v440_v13 = vadd.f32 %v439_v6, %v436_v11 }
 0x228   :  { %v449_v14 = vadd.f32 %v448_v9, %v437_v12 }
 0x229   :  { %v441_v15 = vrot.slane %v440_v13, 4 }
 0x22a   :  { %v450_v16 = vrot.slane %v449_v14, 4 }
 0x22b   :  { %v442_v17 = vadd.f32 %v441_v15, %v440_v13 }
 0x22c   :  { %v451_v18 = vadd.f32 %v450_v16, %v449_v14 }
 0x22d   :  { %v443_v22 = vrot.slane %v442_v17, 2 }
 0x22e   :  { %v452_v23 = vrot.slane %v451_v18, 2 }
 0x22f   :  { %v444_v24 = vadd.f32 %v443_v22, %v442_v17 }
 0x230   :  { %v453_v25 = vadd.f32 %v452_v23, %v451_v18 }
 0x231   :  { %v445_v28 = vrot.slane %v444_v24, 1 }
 0x232   :  { %v454_v29 = vrot.slane %v453_v25, 1 }
 0x233   :  { %v446_v30 = vadd.f32 %v445_v28, %v444_v24 }
 0x234   :  { %v455_v31 = vadd.f32 %v454_v29, %v453_v25 }
 0x236   :  { %v458_v33 = vcombine.low %v446_v30, %v455_v31 }
 0x238   :  { %v465_v34 = vrot.slane %v458_v33, %v464_v32 }
 0x23a   :  { %v472_v35 = vrot.slane %v465_v34, %v464_v32 }
 0x23c   :  { %478 = vst.msk [vmem:[#allocation2] sm:$0x3] %vm476_vm3, %v472_v35 }
 0x23d   :  { %684 = shalt.err (!%p681_p4)
}
 0x23e   :  { %s685_s25 = scalar_lea.hbm %s946_s4, 32 }
 0x23f   :  { %p686_p5 = scmp.ne.s32.totalorder %s946_s4, %s685_s25  ;;  %p689_p6 = scmp.lt.u32.totalorder %s685_s25, %s946_s4 }
 0x241   :  { %p691_p7 = pnand %p689_p6, %p686_p5 }
 0x243   :  { %694 = shalt.err (!%p691_p7)
}
 0x244   :  { %488 = dma.vmem_to_hbm [thread:$0]  %s486_s21, 32, %s946_s4, [#allocation3]  }
 0x245   :  { %695 = dma.done.wait [#allocation3], 32  }
 0x246   :  { %696 = vsyncadd [#allocation3], 4294967264 }
 0x247   :  { %492 = vsyncpa [#allocation3], 1 }

</bundles_post_ra>
